<compile_context>
chip_gen: v7x
topology: tpu7x:2x2x1
jax: 0.10.0
libtpu: 0.0.40
codegen_flags: <defaults>
</compile_context>

<pallas_src>
import functools
import math

import jax
import jax.numpy as jnp
from jax import lax
from jax.experimental import pallas as pl
from jax.experimental.pallas import tpu as pltpu


_LN_EPS = 1e-5
_GELU_C = math.sqrt(2.0 / math.pi)
_NEG_INF = -1e30


def _layernorm(x, gamma, beta):
    # x: (T, C) f32; gamma/beta: (1, C) f32
    mu = jnp.mean(x, axis=-1, keepdims=True)
    var = jnp.mean((x - mu) ** 2, axis=-1, keepdims=True)
    return (x - mu) * lax.rsqrt(var + _LN_EPS) * gamma + beta


def _gelu_tanh(x):
    # nn.GELU(approximate='tanh')
    return 0.5 * x * (1.0 + jnp.tanh(_GELU_C * (x + 0.044715 * x * x * x)))


# ---------------------------------------------------------------------------
# Kernel A (grid (B, T//TQ)): LN1 + fused QKV projection, lane-dense outputs
# ---------------------------------------------------------------------------
def _qkv_kernel(x_ref, ln1_g_ref, ln1_b_ref,
                wq_ref, bq_ref, wk_ref, bk_ref, wv_ref, bv_ref,
                q_ref, k_ref, v_ref):
    x = x_ref[0].astype(jnp.float32)                       # (TQ, C)
    h = _layernorm(x, ln1_g_ref[...], ln1_b_ref[...])
    hc = h.astype(wq_ref.dtype)
    od = q_ref.dtype
    # Three full-width (TQ, C) stores -> unmasked lane-dense vst.
    q_ref[0] = (jnp.dot(hc, wq_ref[...], preferred_element_type=jnp.float32)
                + bq_ref[...]).astype(od)
    k_ref[0] = (jnp.dot(hc, wk_ref[...], preferred_element_type=jnp.float32)
                + bk_ref[...]).astype(od)
    v_ref[0] = (jnp.dot(hc, wv_ref[...], preferred_element_type=jnp.float32)
                + bv_ref[...]).astype(od)


# ---------------------------------------------------------------------------
# Kernel B (grid (B, T//TQ, n_groups, T//TK)): flash causal attention with
# streamed KV tiles + per-head-group output projection + first residual.
# ---------------------------------------------------------------------------
def _attn_kernel(x_ref, q_ref, k_ref, v_ref, w_aproj_ref, b_aproj_ref,
                 o_ref, m_scr, l_scr, acc_scr, y_scr,
                 *, tq, tk, head_block, head_dim):
    qi = pl.program_id(1)
    g = pl.program_id(2)
    kj = pl.program_id(3)
    n_grp = pl.num_programs(2)
    nkv = pl.num_programs(3)

    HB, D = head_block, head_dim
    scale = 1.0 / math.sqrt(D)
    exact = jnp.dtype(q_ref.dtype) == jnp.dtype(jnp.float32)

    q_start = qi * tq
    k_start = kj * tk
    needed = k_start <= q_start + tq - 1            # tile intersects causal region
    unmasked = k_start + tk - 1 <= q_start          # tile fully below the diagonal

    @pl.when(jnp.logical_and(kj == 0, g == 0))
    def _init_qtile():
        y_scr[...] = jnp.zeros(y_scr.shape, jnp.float32)

    @pl.when(kj == 0)
    def _init_group():
        m_scr[...] = jnp.full(m_scr.shape, -jnp.inf, jnp.float32)
        l_scr[...] = jnp.zeros(l_scr.shape, jnp.float32)
        acc_scr[...] = jnp.zeros(acc_scr.shape, jnp.float32)

    def _online_softmax_step(masked):
        # lane-dense (t, HB*D) tiles -> head-major (HB, t, D) on the VMEM tile
        q = jnp.transpose(q_ref[0].reshape(tq, HB, D), (1, 0, 2))
        k = jnp.transpose(k_ref[0].reshape(tk, HB, D), (1, 0, 2))
        v = jnp.transpose(v_ref[0].reshape(tk, HB, D), (1, 0, 2))
        s = jnp.einsum('hqd,hkd->hqk', q, k,
                       preferred_element_type=jnp.float32) * scale
        if masked:  # only the diagonal tile pays for iota/compare/select
            row = q_start + lax.broadcasted_iota(jnp.int32, (tq, tk), 0)
            col = k_start + lax.broadcasted_iota(jnp.int32, (tq, tk), 1)
            s = jnp.where((col <= row)[None, :, :], s, _NEG_INF)
        m_prev = m_scr[...]
        m_new = jnp.maximum(m_prev, jnp.max(s, axis=-1, keepdims=True))
        alpha = jnp.exp(m_prev - m_new)
        p = jnp.exp(s - m_new)
        l_scr[...] = alpha * l_scr[...] + jnp.sum(p, axis=-1, keepdims=True)
        acc_scr[...] = alpha * acc_scr[...] + jnp.einsum(
            'hqk,hkd->hqd', p.astype(v.dtype), v,
            preferred_element_type=jnp.float32)
        m_scr[...] = m_new

    @pl.when(jnp.logical_and(needed, unmasked))
    def _():
        _online_softmax_step(False)

    @pl.when(jnp.logical_and(needed, jnp.logical_not(unmasked)))
    def _():
        _online_softmax_step(True)

    @pl.when(kj == nkv - 1)
    def _finish_group():
        acc = acc_scr[...]                                  # (HB, TQ, D)
        l = l_scr[...]                                      # (HB, TQ, 1)
        if exact:
            y = acc / l
        else:
            y = acc * pl.reciprocal(l, approx=True)         # EUP slot, ~free
        # heads -> channels for this group; accumulate its slice of the out-proj:
        #   y_full @ W  ==  sum_g  y_g @ W[g*HB*D:(g+1)*HB*D, :]
        y = jnp.transpose(y, (1, 0, 2)).reshape(tq, HB * D)
        y_scr[...] += jnp.dot(y.astype(w_aproj_ref.dtype), w_aproj_ref[...],
                              preferred_element_type=jnp.float32)

    @pl.when(jnp.logical_and(kj == nkv - 1, g == n_grp - 1))
    def _write():
        x1 = x_ref[0].astype(jnp.float32) + y_scr[...] + b_aproj_ref[...]
        o_ref[0] = x1.astype(o_ref.dtype)                   # first residual


# ---------------------------------------------------------------------------
# Kernel C (grid (B, T//TQ, 4C//hk)): LN2 + hidden-dim-streamed MLP + residual
# ---------------------------------------------------------------------------
def _mlp_kernel(x1_ref, ln2_g_ref, ln2_b_ref,
                w_fc_ref, b_fc_ref, w_mproj_ref, b_mproj_ref,
                o_ref, h2_scr, acc_scr):
    hj = pl.program_id(2)
    nh = pl.num_programs(2)

    @pl.when(hj == 0)
    def _init():
        x1 = x1_ref[0].astype(jnp.float32)
        h2 = _layernorm(x1, ln2_g_ref[...], ln2_b_ref[...])
        h2_scr[...] = h2.astype(h2_scr.dtype)
        acc_scr[...] = jnp.zeros(acc_scr.shape, jnp.float32)

    f = jnp.dot(h2_scr[...], w_fc_ref[...], preferred_element_type=jnp.float32)
    f = _gelu_tanh(f + b_fc_ref[...])
    acc_scr[...] += jnp.dot(f.astype(w_mproj_ref.dtype), w_mproj_ref[...],
                            preferred_element_type=jnp.float32)

    @pl.when(hj == nh - 1)
    def _fin():
        out = x1_ref[0].astype(jnp.float32) + acc_scr[...] + b_mproj_ref[...]
        o_ref[0] = out.astype(o_ref.dtype)                  # second residual


# ---------------------------------------------------------------------------
# Wrapper
# ---------------------------------------------------------------------------
def _pick_head_block(n_head, head_dim):
    """Smallest head group whose lane width is 128-aligned (prefer >= 256)."""
    aligned = None
    for cand in range(1, n_head + 1):
        if n_head % cand:
            continue
        width = cand * head_dim
        if width % 128:
            continue
        if width >= 256:
            return cand
        if aligned is None:
            aligned = cand
    return aligned if aligned is not None else n_head


def gpt2_block(x, params, n_head, *, compute_dtype=None, tq=None, tk=None,
               head_block=None, mlp_block=512, vmem_limit_mb=48,
               single_buffer_weights=False):
    B, T, C = x.shape
    assert C % n_head == 0
    D = C // n_head
    cd = jnp.dtype(compute_dtype) if compute_dtype is not None else jnp.dtype(x.dtype)

    tq = (T if T <= 128 else 128) if tq is None else tq
    tk = tq if tk is None else tk
    assert T % tq == 0 and T % tk == 0
    assert (tq % 8 == 0 or tq == T) and (tk % 8 == 0 or tk == T)
    nq, nkv = T // tq, T // tk

    if head_block is None:
        head_block = _pick_head_block(n_head, D)
    assert n_head % head_block == 0
    assert (head_block * D) % 128 == 0 or head_block == n_head
    n_grp = n_head // head_block
    hbd = head_block * D

    H4 = 4 * C
    if mlp_block < H4 and H4 % mlp_block == 0 and mlp_block % 128 == 0:
        hk = mlp_block
    else:
        hk = H4
    nh = H4 // hk

    f32 = jnp.float32
    # LN params / biases lane-dense (1, N) f32; weights pre-transposed ONCE.
    ln1_g = params["ln1_g"].reshape(1, C).astype(f32)
    ln1_b = params["ln1_b"].reshape(1, C).astype(f32)
    ln2_g = params["ln2_g"].reshape(1, C).astype(f32)
    ln2_b = params["ln2_b"].reshape(1, C).astype(f32)
    w_attn_t = params["w_attn"].T.astype(cd)               # (C, 3C)
    wq_t = w_attn_t[:, 0:C]
    wk_t = w_attn_t[:, C:2 * C]
    wv_t = w_attn_t[:, 2 * C:3 * C]
    b_attn = params["b_attn"].astype(f32)
    bq = b_attn[0:C].reshape(1, C)
    bk = b_attn[C:2 * C].reshape(1, C)
    bv = b_attn[2 * C:3 * C].reshape(1, C)
    w_aproj_t = params["w_aproj"].T.astype(cd)             # (C, C)
    b_aproj = params["b_aproj"].reshape(1, C).astype(f32)
    w_fc_t = params["w_fc"].T.astype(cd)                   # (C, 4C)
    b_fc = params["b_fc"].reshape(1, H4).astype(f32)
    w_mproj_t = params["w_mproj"].T.astype(cd)             # (4C, C)
    b_mproj = params["b_mproj"].reshape(1, C).astype(f32)

    vmem = vmem_limit_mb * 1024 * 1024
    # Never-changing weight blocks can be single-buffered (halves their VMEM,
    # useful on v7x's 64 MiB). Off by default.
    wmode = {"pipeline_mode": pl.Buffered(1)} if single_buffer_weights else {}

    def const_spec(shape):
        nd = len(shape)
        return pl.BlockSpec(shape, lambda *_, _nd=nd: (0,) * _nd, **wmode)

    # ---- Kernel A: LN1 + QKV projection -> lane-dense (B, T, C) q/k/v ----
    q, k, v = pl.pallas_call(
        _qkv_kernel,
        out_shape=tuple(jax.ShapeDtypeStruct((B, T, C), cd) for _ in range(3)),
        grid_spec=pltpu.PrefetchScalarGridSpec(
            num_scalar_prefetch=0,
            grid=(B, nq),
            in_specs=[
                pl.BlockSpec((1, tq, C), lambda b, i: (b, i, 0)),
                const_spec((1, C)), const_spec((1, C)),
                const_spec((C, C)), const_spec((1, C)),
                const_spec((C, C)), const_spec((1, C)),
                const_spec((C, C)), const_spec((1, C)),
            ],
            out_specs=tuple(pl.BlockSpec((1, tq, C), lambda b, i: (b, i, 0))
                            for _ in range(3)),
        ),
        compiler_params=pltpu.CompilerParams(
            dimension_semantics=("parallel", "parallel"),
            vmem_limit_bytes=vmem),
    )(x, ln1_g, ln1_b, wq_t, bq, wk_t, bk, wv_t, bv)

    # ---- Kernel B: streamed-KV flash attention + out-proj + residual ----
    def kv_idx(b, i, g, j):
        kmax = (i * tq + tq - 1) // tk          # causal clamp: no DMA past diag
        return (b, jnp.minimum(j, kmax), g)

    x1 = pl.pallas_call(
        functools.partial(_attn_kernel, tq=tq, tk=tk,
                          head_block=head_block, head_dim=D),
        out_shape=jax.ShapeDtypeStruct((B, T, C), x.dtype),
        grid_spec=pltpu.PrefetchScalarGridSpec(
            num_scalar_prefetch=0,
            grid=(B, nq, n_grp, nkv),
            in_specs=[
                pl.BlockSpec((1, tq, C), lambda b, i, g, j: (b, i, 0)),    # x
                pl.BlockSpec((1, tq, hbd), lambda b, i, g, j: (b, i, g)),  # q grp
                pl.BlockSpec((1, tk, hbd), kv_idx),                        # k tile
                pl.BlockSpec((1, tk, hbd), kv_idx),                        # v tile
                pl.BlockSpec((hbd, C), lambda b, i, g, j: (g, 0)),         # W_out rows
                const_spec((1, C)),                                        # b_out
            ],
            out_specs=pl.BlockSpec((1, tq, C), lambda b, i, g, j: (b, i, 0)),
            scratch_shapes=[
                pltpu.VMEM((head_block, tq, 1), jnp.float32),   # m
                pltpu.VMEM((head_block, tq, 1), jnp.float32),   # l
                pltpu.VMEM((head_block, tq, D), jnp.float32),   # softmax acc
                pltpu.VMEM((tq, C), jnp.float32),               # out-proj acc
            ],
        ),
        compiler_params=pltpu.CompilerParams(
            dimension_semantics=("parallel", "parallel", "arbitrary", "arbitrary"),
            vmem_limit_bytes=vmem),
    )(x, q, k, v, w_aproj_t, b_aproj)

    # ---- Kernel C: LN2 + hidden-dim-streamed MLP + residual ----
    out = pl.pallas_call(
        _mlp_kernel,
        out_shape=jax.ShapeDtypeStruct((B, T, C), x.dtype),
        grid_spec=pltpu.PrefetchScalarGridSpec(
            num_scalar_prefetch=0,
            grid=(B, nq, nh),
            in_specs=[
                pl.BlockSpec((1, tq, C), lambda b, i, h: (b, i, 0)),       # x1
                const_spec((1, C)), const_spec((1, C)),                    # ln2
                pl.BlockSpec((C, hk), lambda b, i, h: (0, h)),             # W_fc cols
                pl.BlockSpec((1, hk), lambda b, i, h: (0, h)),             # b_fc cols
                pl.BlockSpec((hk, C), lambda b, i, h: (h, 0)),             # W_proj rows
                const_spec((1, C)),                                        # b_proj
            ],
            out_specs=pl.BlockSpec((1, tq, C), lambda b, i, h: (b, i, 0)),
            scratch_shapes=[
                pltpu.VMEM((tq, C), cd),           # LN2(x1), computed once per tile
                pltpu.VMEM((tq, C), jnp.float32),  # MLP accumulator
            ],
        ),
        compiler_params=pltpu.CompilerParams(
            dimension_semantics=("parallel", "parallel", "arbitrary"),
            vmem_limit_bytes=vmem),
    )(x1, ln2_g, ln2_b, w_fc_t, b_fc, w_mproj_t, b_mproj)
    return out


# ---------------------------------------------------------------------------
# Pure-JAX reference (mirrors the PyTorch Block) and parameter init
# ---------------------------------------------------------------------------
def gpt2_block_ref(x, params, n_head):
    def ln(x, g, b):
        mu = x.mean(-1, keepdims=True)
        var = ((x - mu) ** 2).mean(-1, keepdims=True)
        return (x - mu) * lax.rsqrt(var + _LN_EPS) * g + b

    B, T, C = x.shape
    D = C // n_head
    h = ln(x, params["ln1_g"], params["ln1_b"])
    qkv = h @ params["w_attn"].T + params["b_attn"]
    q, k, v = jnp.split(qkv, 3, axis=-1)
    q = q.reshape(B, T, n_head, D).transpose(0, 2, 1, 3)
    k = k.reshape(B, T, n_head, D).transpose(0, 2, 1, 3)
    v = v.reshape(B, T, n_head, D).transpose(0, 2, 1, 3)
    att = (q @ jnp.swapaxes(k, -1, -2)) * (1.0 / math.sqrt(D))
    mask = jnp.tril(jnp.ones((T, T), bool))
    att = jnp.where(mask[None, None], att, -jnp.inf)
    att = jax.nn.softmax(att, axis=-1)
    y = (att @ v).transpose(0, 2, 1, 3).reshape(B, T, C)
    y = y @ params["w_aproj"].T + params["b_aproj"]
    x1 = x + y
    h2 = ln(x1, params["ln2_g"], params["ln2_b"])
    f = _gelu_tanh(h2 @ params["w_fc"].T + params["b_fc"])
    m = f @ params["w_mproj"].T + params["b_mproj"]
    return x1 + m


def init_params(key, n_embd):
    ks = jax.random.split(key, 12)
    C = n_embd
    std = 0.02
    n = lambda k, shape: std * jax.random.normal(k, shape, jnp.float32)
    return {
        "ln1_g": 1.0 + 0.1 * jax.random.normal(ks[0], (C,), jnp.float32),
        "ln1_b": 0.1 * jax.random.normal(ks[1], (C,), jnp.float32),
        "w_attn": n(ks[2], (3 * C, C)),
        "b_attn": n(ks[3], (3 * C,)),
        "w_aproj": n(ks[4], (C, C)),
        "b_aproj": n(ks[5], (C,)),
        "ln2_g": 1.0 + 0.1 * jax.random.normal(ks[6], (C,), jnp.float32),
        "ln2_b": 0.1 * jax.random.normal(ks[7], (C,), jnp.float32),
        "w_fc": n(ks[8], (4 * C, C)),
        "b_fc": n(ks[9], (4 * C,)),
        "w_mproj": n(ks[10], (C, 4 * C)),
        "b_mproj": n(ks[11], (C,)),
    }


if __name__ == "__main__":
    B, T, C, n_head = 2, 16, 64, 4   # block_size == T
    key = jax.random.PRNGKey(0)
    kx, kp = jax.random.split(key)
    x = jax.random.normal(kx, (B, T, C), jnp.float32)
    params = init_params(kp, C)

    # Exact f32 path.  Tile sizes chosen so the tiled attention (2 q-tiles x
    # 2 kv-tiles with causal skip / clamped index map) and the streamed MLP
    # (2 hidden tiles) are all exercised even at these small shapes.
    # Pass compute_dtype=jnp.bfloat16 for the bf16 MXU path.
    out = gpt2_block(x, params, n_head, tq=8, tk=8, mlp_block=128)
    jax.block_until_ready(out)
    assert out.shape == (B, T, C)

    ref = gpt2_block_ref(x, params, n_head)
    err = float(jnp.max(jnp.abs(out - ref)))
    assert err < 1e-3, f"mismatch vs reference: {err}"
    print("KERNEL_OK")
</pallas_src>

<mosaic_0001>
module attributes {stable_mosaic.version = 11 : i64} {
  func.func @_qkv_kernel(%arg0: i32, %arg1: i32, %arg2: memref<1x8x64xf32, #tpu.memory_space<vmem>>, %arg3: memref<1x64xf32, #tpu.memory_space<vmem>>, %arg4: memref<1x64xf32, #tpu.memory_space<vmem>>, %arg5: memref<64x64xf32, #tpu.memory_space<vmem>>, %arg6: memref<1x64xf32, #tpu.memory_space<vmem>>, %arg7: memref<64x64xf32, #tpu.memory_space<vmem>>, %arg8: memref<1x64xf32, #tpu.memory_space<vmem>>, %arg9: memref<64x64xf32, #tpu.memory_space<vmem>>, %arg10: memref<1x64xf32, #tpu.memory_space<vmem>>, %arg11: memref<1x8x64xf32, #tpu.memory_space<vmem>>, %arg12: memref<1x8x64xf32, #tpu.memory_space<vmem>>, %arg13: memref<1x8x64xf32, #tpu.memory_space<vmem>>) attributes {dimension_semantics = [#tpu.dimension_semantics<parallel>, #tpu.dimension_semantics<parallel>], iteration_bounds = array<i64: 2, 2>, scalar_prefetch = 0 : i64, scratch_operands = 0 : i64, tpu.core_type = #tpu.core_type<tc>, window_params = [{transform_indices = @transform_0, window_bounds = array<i64: 1, 8, 64>}, {pipeline_mode = #tpu.pipeline_mode<synchronous>, transform_indices = @transform_1, window_bounds = array<i64: 1, 64>}, {pipeline_mode = #tpu.pipeline_mode<synchronous>, transform_indices = @transform_2, window_bounds = array<i64: 1, 64>}, {pipeline_mode = #tpu.pipeline_mode<synchronous>, transform_indices = @transform_3, window_bounds = array<i64: 64, 64>}, {pipeline_mode = #tpu.pipeline_mode<synchronous>, transform_indices = @transform_4, window_bounds = array<i64: 1, 64>}, {pipeline_mode = #tpu.pipeline_mode<synchronous>, transform_indices = @transform_5, window_bounds = array<i64: 64, 64>}, {pipeline_mode = #tpu.pipeline_mode<synchronous>, transform_indices = @transform_6, window_bounds = array<i64: 1, 64>}, {pipeline_mode = #tpu.pipeline_mode<synchronous>, transform_indices = @transform_7, window_bounds = array<i64: 64, 64>}, {pipeline_mode = #tpu.pipeline_mode<synchronous>, transform_indices = @transform_8, window_bounds = array<i64: 1, 64>}, {transform_indices = @transform_9, window_bounds = array<i64: 1, 8, 64>}, {transform_indices = @transform_10, window_bounds = array<i64: 1, 8, 64>}, {transform_indices = @transform_11, window_bounds = array<i64: 1, 8, 64>}]} {
    %c0 = arith.constant 0 : index
    %c0_0 = arith.constant 0 : index
    %c0_1 = arith.constant 0 : index
    %0 = vector.load %arg2[%c0, %c0_0, %c0_1] : memref<1x8x64xf32, #tpu.memory_space<vmem>>, vector<1x8x64xf32>
    %1 = vector.shape_cast %0 : vector<1x8x64xf32> to vector<8x64xf32>
    %c0_2 = arith.constant 0 : index
    %c0_3 = arith.constant 0 : index
    %2 = vector.load %arg3[%c0_2, %c0_3] : memref<1x64xf32, #tpu.memory_space<vmem>>, vector<1x64xf32>
    %c0_4 = arith.constant 0 : index
    %c0_5 = arith.constant 0 : index
    %3 = vector.load %arg4[%c0_4, %c0_5] : memref<1x64xf32, #tpu.memory_space<vmem>>, vector<1x64xf32>
    %cst = arith.constant dense<0.000000e+00> : vector<8xf32>
    %4 = vector.multi_reduction <add>, %1, %cst [1] : vector<8x64xf32> to vector<8xf32>
    %5 = vector.shape_cast %4 : vector<8xf32> to vector<8x1xf32>
    %cst_6 = arith.constant 6.400000e+01 : f32
    %6 = vector.broadcast %cst_6 : f32 to vector<8x1xf32>
    %7 = arith.divf %5, %6 : vector<8x1xf32>
    %8 = vector.broadcast %7 : vector<8x1xf32> to vector<8x64xf32>
    %9 = arith.subf %1, %8 : vector<8x64xf32>
    %10 = arith.mulf %9, %9 : vector<8x64xf32>
    %cst_7 = arith.constant dense<0.000000e+00> : vector<8xf32>
    %11 = vector.multi_reduction <add>, %10, %cst_7 [1] : vector<8x64xf32> to vector<8xf32>
    %12 = vector.shape_cast %11 : vector<8xf32> to vector<8x1xf32>
    %cst_8 = arith.constant 6.400000e+01 : f32
    %13 = vector.broadcast %cst_8 : f32 to vector<8x1xf32>
    %14 = arith.divf %12, %13 : vector<8x1xf32>
    %15 = vector.broadcast %7 : vector<8x1xf32> to vector<8x64xf32>
    %16 = arith.subf %1, %15 : vector<8x64xf32>
    %cst_9 = arith.constant 9.99999974E-6 : f32
    %17 = vector.broadcast %cst_9 : f32 to vector<8x1xf32>
    %18 = arith.addf %14, %17 : vector<8x1xf32>
    %19 = math.rsqrt %18 : vector<8x1xf32>
    %20 = vector.broadcast %19 : vector<8x1xf32> to vector<8x64xf32>
    %21 = arith.mulf %16, %20 : vector<8x64xf32>
    %22 = vector.broadcast %2 : vector<1x64xf32> to vector<8x64xf32>
    %23 = arith.mulf %21, %22 : vector<8x64xf32>
    %24 = vector.broadcast %3 : vector<1x64xf32> to vector<8x64xf32>
    %25 = arith.addf %23, %24 : vector<8x64xf32>
    %c0_10 = arith.constant 0 : index
    %c0_11 = arith.constant 0 : index
    %26 = vector.load %arg5[%c0_10, %c0_11] : memref<64x64xf32, #tpu.memory_space<vmem>>, vector<64x64xf32>
    %cst_12 = arith.constant dense<0.000000e+00> : vector<8x64xf32>
    %27 = tpu.matmul %25, %26, %cst_12 {dimension_numbers = #tpu.dot_dimension_numbers<[1], [0], [0], [1], [0, 0, 1, 1], [], []>} : vector<8x64xf32>, vector<64x64xf32>, vector<8x64xf32> -> vector<8x64xf32>
    %c0_13 = arith.constant 0 : index
    %c0_14 = arith.constant 0 : index
    %28 = vector.load %arg6[%c0_13, %c0_14] : memref<1x64xf32, #tpu.memory_space<vmem>>, vector<1x64xf32>
    %29 = vector.broadcast %28 : vector<1x64xf32> to vector<8x64xf32>
    %30 = arith.addf %27, %29 : vector<8x64xf32>
    %c0_15 = arith.constant 0 : index
    %c0_16 = arith.constant 0 : index
    %c0_17 = arith.constant 0 : index
    %31 = vector.load %arg11[%c0_15, %c0_16, %c0_17] : memref<1x8x64xf32, #tpu.memory_space<vmem>>, vector<1x8x64xf32>
    %32 = vector.shape_cast %31 : vector<1x8x64xf32> to vector<8x64xf32>
    %33 = vector.shape_cast %30 : vector<8x64xf32> to vector<1x8x64xf32>
    tpu.vector_store %arg11[%c0_15, %c0_16, %c0_17], %33 {strides = array<i32>} : memref<1x8x64xf32, #tpu.memory_space<vmem>>, vector<1x8x64xf32>,
    %c0_18 = arith.constant 0 : index
    %c0_19 = arith.constant 0 : index
    %34 = vector.load %arg7[%c0_18, %c0_19] : memref<64x64xf32, #tpu.memory_space<vmem>>, vector<64x64xf32>
    %cst_20 = arith.constant dense<0.000000e+00> : vector<8x64xf32>
    %35 = tpu.matmul %25, %34, %cst_20 {dimension_numbers = #tpu.dot_dimension_numbers<[1], [0], [0], [1], [0, 0, 1, 1], [], []>} : vector<8x64xf32>, vector<64x64xf32>, vector<8x64xf32> -> vector<8x64xf32>
    %c0_21 = arith.constant 0 : index
    %c0_22 = arith.constant 0 : index
    %36 = vector.load %arg8[%c0_21, %c0_22] : memref<1x64xf32, #tpu.memory_space<vmem>>, vector<1x64xf32>
    %37 = vector.broadcast %36 : vector<1x64xf32> to vector<8x64xf32>
    %38 = arith.addf %35, %37 : vector<8x64xf32>
    %c0_23 = arith.constant 0 : index
    %c0_24 = arith.constant 0 : index
    %c0_25 = arith.constant 0 : index
    %39 = vector.load %arg12[%c0_23, %c0_24, %c0_25] : memref<1x8x64xf32, #tpu.memory_space<vmem>>, vector<1x8x64xf32>
    %40 = vector.shape_cast %39 : vector<1x8x64xf32> to vector<8x64xf32>
    %41 = vector.shape_cast %38 : vector<8x64xf32> to vector<1x8x64xf32>
    tpu.vector_store %arg12[%c0_23, %c0_24, %c0_25], %41 {strides = array<i32>} : memref<1x8x64xf32, #tpu.memory_space<vmem>>, vector<1x8x64xf32>,
    %c0_26 = arith.constant 0 : index
    %c0_27 = arith.constant 0 : index
    %42 = vector.load %arg9[%c0_26, %c0_27] : memref<64x64xf32, #tpu.memory_space<vmem>>, vector<64x64xf32>
    %cst_28 = arith.constant dense<0.000000e+00> : vector<8x64xf32>
    %43 = tpu.matmul %25, %42, %cst_28 {dimension_numbers = #tpu.dot_dimension_numbers<[1], [0], [0], [1], [0, 0, 1, 1], [], []>} : vector<8x64xf32>, vector<64x64xf32>, vector<8x64xf32> -> vector<8x64xf32>
    %c0_29 = arith.constant 0 : index
    %c0_30 = arith.constant 0 : index
    %44 = vector.load %arg10[%c0_29, %c0_30] : memref<1x64xf32, #tpu.memory_space<vmem>>, vector<1x64xf32>
    %45 = vector.broadcast %44 : vector<1x64xf32> to vector<8x64xf32>
    %46 = arith.addf %43, %45 : vector<8x64xf32>
    %c0_31 = arith.constant 0 : index
    %c0_32 = arith.constant 0 : index
    %c0_33 = arith.constant 0 : index
    %47 = vector.load %arg13[%c0_31, %c0_32, %c0_33] : memref<1x8x64xf32, #tpu.memory_space<vmem>>, vector<1x8x64xf32>
    %48 = vector.shape_cast %47 : vector<1x8x64xf32> to vector<8x64xf32>
    %49 = vector.shape_cast %46 : vector<8x64xf32> to vector<1x8x64xf32>
    tpu.vector_store %arg13[%c0_31, %c0_32, %c0_33], %49 {strides = array<i32>} : memref<1x8x64xf32, #tpu.memory_space<vmem>>, vector<1x8x64xf32>,
    return
  }
  func.func @transform_0(%arg0: i32, %arg1: i32) -> (i32, i32, i32) {
    %c0_i32 = arith.constant 0 : i32
    %c0_i32_0 = arith.constant 0 : i32
    return %arg0, %arg1, %c0_i32 : i32, i32, i32
  }
  func.func @transform_1(%arg0: i32, %arg1: i32) -> (i32, i32) {
    %c0_i32 = arith.constant 0 : i32
    %c0_i32_0 = arith.constant 0 : i32
    %c0_i32_1 = arith.constant 0 : i32
    return %c0_i32, %c0_i32_0 : i32, i32
  }
  func.func @transform_2(%arg0: i32, %arg1: i32) -> (i32, i32) {
    %c0_i32 = arith.constant 0 : i32
    %c0_i32_0 = arith.constant 0 : i32
    %c0_i32_1 = arith.constant 0 : i32
    return %c0_i32, %c0_i32_0 : i32, i32
  }
  func.func @transform_3(%arg0: i32, %arg1: i32) -> (i32, i32) {
    %c0_i32 = arith.constant 0 : i32
    %c0_i32_0 = arith.constant 0 : i32
    %c0_i32_1 = arith.constant 0 : i32
    return %c0_i32, %c0_i32_0 : i32, i32
  }
  func.func @transform_4(%arg0: i32, %arg1: i32) -> (i32, i32) {
    %c0_i32 = arith.constant 0 : i32
    %c0_i32_0 = arith.constant 0 : i32
    %c0_i32_1 = arith.constant 0 : i32
    return %c0_i32, %c0_i32_0 : i32, i32
  }
  func.func @transform_5(%arg0: i32, %arg1: i32) -> (i32, i32) {
    %c0_i32 = arith.constant 0 : i32
    %c0_i32_0 = arith.constant 0 : i32
    %c0_i32_1 = arith.constant 0 : i32
    return %c0_i32, %c0_i32_0 : i32, i32
  }
  func.func @transform_6(%arg0: i32, %arg1: i32) -> (i32, i32) {
    %c0_i32 = arith.constant 0 : i32
    %c0_i32_0 = arith.constant 0 : i32
    %c0_i32_1 = arith.constant 0 : i32
    return %c0_i32, %c0_i32_0 : i32, i32
  }
  func.func @transform_7(%arg0: i32, %arg1: i32) -> (i32, i32) {
    %c0_i32 = arith.constant 0 : i32
    %c0_i32_0 = arith.constant 0 : i32
    %c0_i32_1 = arith.constant 0 : i32
    return %c0_i32, %c0_i32_0 : i32, i32
  }
  func.func @transform_8(%arg0: i32, %arg1: i32) -> (i32, i32) {
    %c0_i32 = arith.constant 0 : i32
    %c0_i32_0 = arith.constant 0 : i32
    %c0_i32_1 = arith.constant 0 : i32
    return %c0_i32, %c0_i32_0 : i32, i32
  }
  func.func @transform_9(%arg0: i32, %arg1: i32) -> (i32, i32, i32) {
    %c0_i32 = arith.constant 0 : i32
    %c0_i32_0 = arith.constant 0 : i32
    return %arg0, %arg1, %c0_i32 : i32, i32, i32
  }
  func.func @transform_10(%arg0: i32, %arg1: i32) -> (i32, i32, i32) {
    %c0_i32 = arith.constant 0 : i32
    %c0_i32_0 = arith.constant 0 : i32
    return %arg0, %arg1, %c0_i32 : i32, i32, i32
  }
  func.func @transform_11(%arg0: i32, %arg1: i32) -> (i32, i32, i32) {
    %c0_i32 = arith.constant 0 : i32
    %c0_i32_0 = arith.constant 0 : i32
    return %arg0, %arg1, %c0_i32 : i32, i32, i32
  }
}

</mosaic_0001>

<bundles_post_ra>
// kernel: tpu_custom_call.1
= control target key start
LH: loop header
LB: loop body
LE: loop exit
PB: predicated region body
PF: predicated region fallthrough
CT: control target
= control target key end

     0   :  { %s2067_s0 = inlined_call_operand.hbm [shape: f32[2,16,64], index: 0, kind: input, shape index: {}]   ;;  %s2068_s1 = inlined_call_operand.vmem [shape: f32[1,64], index: 1, kind: input, shape index: {}]   ;;  %s2069_s2 = inlined_call_operand.vmem [shape: f32[1,64], index: 2, kind: input, shape index: {}]   ;;  %s2070_s3 = inlined_call_operand.hbm [shape: f32[64,64], index: 3, kind: input, shape index: {}]   ;;  %s2071_s4 = inlined_call_operand.vmem [shape: f32[1,64], index: 4, kind: input, shape index: {}]   ;;  %s2072_s5 = inlined_call_operand.hbm [shape: f32[64,64], index: 5, kind: input, shape index: {}]   ;;  %s2073_s6 = inlined_call_operand.vmem [shape: f32[1,64], index: 6, kind: input, shape index: {}]   ;;  %s2074_s7 = inlined_call_operand.hbm [shape: f32[64,64], index: 7, kind: input, shape index: {}]   ;;  %s2075_s8 = inlined_call_operand.vmem [shape: f32[1,64], index: 8, kind: input, shape index: {}]   ;;  %s2076_s9 = inlined_call_operand.hbm [shape: f32[2,16,64], index: 9, kind: output, shape index: {0}]   ;;  %s2077_s10 = inlined_call_operand.hbm [shape: f32[2,16,64], index: 10, kind: output, shape index: {1}]   ;;  %s2078_s11 = inlined_call_operand.hbm [shape: f32[2,16,64], index: 11, kind: output, shape index: {2}]  }
   0x1   :  { %2088 = sst [smem:[#allocation22_spill]] %s2070_s3 }
   0x2   :  { %2089 = sst [smem:[#allocation23_spill]] %s2071_s4 }
   0x3   :  { %2090 = sst [smem:[#allocation24_spill]] %s2072_s5 }
   0x4   :  { %2091 = sst [smem:[#allocation25_spill]] %s2073_s6 }
   0x5   :  { %2092 = sst [smem:[#allocation26_spill]] %s2074_s7 }
   0x6   :  { %2093 = sst [smem:[#allocation27_spill]] %s2075_s8 }
   0x7   :  { %2094 = sst [smem:[#allocation28_spill]] %s2076_s9 }
   0x8   :  { %2095 = sst [smem:[#allocation29_spill]] %s2077_s10 }
   0x9   :  { %2096 = sst [smem:[#allocation30_spill]] %s2078_s11 }
   0xa   :  { %17 = vsyncpa [#allocation3], 0 }
   0xb   :  { %19 = vsyncpa [#allocation3 + $0x1], 0 }
   0xc   :  { %20 = vsyncpa [#allocation6], 0 }
   0xd   :  { %21 = vsyncpa [#allocation9], 0 }
   0xe   :  { %22 = vsyncpa [#allocation4], 0 }
   0xf   :  { %24 = vsyncpa [#allocation4 + $0x1], 0 }
  0x10   :  { %25 = vsyncpa [#allocation12], 0 }
  0x11   :  { %27 = vsyncpa [#allocation12 + $0x1], 0  ;;  %s1651_s17 = smov 0   ;;  %s1653_s18 = smov 0  }
  0x12   :  { %s1655_s19 = smov 0   ;;  %s1657_s20 = smov 0  }
  0x13   :  { %s1659_s21 = smov 0   ;;  %s1661_s22 = smov 0  }
  0x14   :  { %s1663_s23 = smov 0   ;;  %s1665_s24 = smov 0  }
  0x15 LB: > { %2097 = sst [smem:[#allocation19_spill]] %s1549_s17  ;;  %s1692_s25 = sadd.s32 4294967295, %s1577_s24   ;;  %s1577_s24 = sphi %s1665_s24, %s33_s24   ;;  %s1573_s23 = sphi %s1663_s23, %s2135_s23   ;;  %s1569_s22 = sphi %s1661_s22, %s2134_s22   ;;  %s1565_s21 = sphi %s1659_s21, %s2133_s21   ;;  %s1561_s20 = sphi %s1657_s20, %s2132_s20   ;;  %s1557_s19 = sphi %s1655_s19, %s2131_s19   ;;  %s1553_s18 = sphi %s1653_s18, %s2130_s18   ;;  %s1549_s17 = sphi %s1651_s17, %s2129_s17  }
  0x16   : > { %2098 = sst [smem:[#allocation20_spill]] %s1561_s20  ;;  %s2079_s26 = sadd.s32 4294967294, %s1577_s24  }
  0x17   : > { %p67_p0 = scmp.ne.s32.totalorder %s1553_s18, %s1549_s17  ;;  %p2084_p1 = scmp.eq.s32.totalorder %s1692_s25, 0 }
  0x18   : > { %p267_p3 = scmp.eq.s32.totalorder %s2079_s26, 3  ;;  %p1016_p5 = scmp.ge.s32.totalorder %s1577_s24, 1 }
  0x19   : > { %p1703_p4 = por %p2084_p1, %p67_p0  ;;  %p330_p7 = scmp.lt.s32.totalorder %s1577_s24, 5 }
  0x1a   : > { %p1708_p6 = por %p267_p3, %p67_p0  ;;  %s1579_s30 = smov [#allocation5]  }
  0x1b   : > { %s2099_s27 = scalar_select %p1703_p4, 1, 0 }
  0x1c   : > { %s2100_s28 = scalar_select %p1708_p6, 1, 0 }
  0x1d   : > { %p1713_p8 = pnand %p1016_p5, %p330_p7  ;;  %s348_s12 = sshll.u32 %s1579_s30, 4  ;;  %s1717_s12 = int_to_ptr.vmem [resolvable:$true] %s348_s12 }
  0x1e   : > { %2101 = sst [smem:[#allocation21_spill]] %s2100_s28  ;;  %s1580_s14 = smov [#allocation7]  }
  0x1f   : > { %s2102_s29 = scalar_select %p1713_p8, 1, 0 }
  0x20   : > { %p1191_p9 = pneg %p1713_p8  ;;  %s364_s15 = sshll.u32 %s1580_s14, 4  ;;  %s1727_s15 = int_to_ptr.vmem [resolvable:$true] %s364_s15 }
  0x21   : > { %s1581_s16 = smov [#allocation8]   ;;  %s2104_s3 = sld [smem:[#allocation22_spill]] }
  0x22   : > { %p1723_p10 = pnand %p1191_p9, %p2084_p1  ;;  %s1729_s26 = sshll.u32 %s1581_s16, 4  ;;  %s381_s26 = int_to_ptr.vmem [resolvable:$true] %s1729_s26 }
  0x24   : > { %p1739_p12 = pneg %p1723_p10 }
  0x27   : > { %s1297_s30 = scalar_lea.hbm %s2104_s3, 1024 }
  0x28   : > { %p1298_p11 = scmp.ne.s32.totalorder %s2104_s3, %s1297_s30  ;;  %p1304_p3 = scmp.lt.u32.totalorder %s1297_s30, %s2104_s3 }
  0x2a   : > { %p1300_p13 = pnand %p1739_p12, %p1298_p11 }
  0x2c   : > { %p1301_p0 = pneg %p1300_p13 }
  0x2e   : > { %p1306_p5 = pnand %p1304_p3, %p1301_p0 }
  0x30   : > { %1309 = shalt.err (!%p1306_p5)
}
  0x31   : > { %s1310_s8 = scalar_lea.vmem %s1717_s12, 1024  ;;  %p1318_p2 = scmp.lt.s32.totalorder %s1717_s12, %s1717_s12 }
  0x32   : > { %p1311_p7 = scmp.ne.s32.totalorder %s1717_s12, %s1310_s8  ;;  %p1319_p6 = scmp.lt.s32.totalorder %s1310_s8, %s1310_s8 }
  0x34   : > { %p1313_p9 = pnand %p1311_p7, %p1739_p12  ;;  %p1320_p11 = por %p1319_p6, %p1318_p2 }
  0x36   : > { %p1314_p1 = pneg %p1313_p9 }
  0x38   : > { %p1321_p13 = pnand %p1320_p11, %p1314_p1 }
  0x3a   : > { %1324 = shalt.err (!%p1321_p13)
}
  0x3b   : > { %s1582_s11 = smov 128   ;;  %s1583_s17 = smov 8  }
  0x3c   : > { %1194 = dma.hbm_to_vmem [thread:$0]  (!%p1723_p10), %s2104_s3, 1024, %s1717_s12, [#allocation6], %s1582_s11, %s1582_s11, %s1583_s17  }
  0x3d   : > { %s2106_s5 = sld [smem:[#allocation24_spill]] }
  0x43   : > { %s1325_s8 = scalar_lea.hbm %s2106_s5, 1024 }
  0x44   : > { %p1326_p1 = scmp.ne.s32.totalorder %s2106_s5, %s1325_s8  ;;  %p1332_p0 = scmp.lt.u32.totalorder %s1325_s8, %s2106_s5 }
  0x46   : > { %p1328_p2 = pnand %p1326_p1, %p1739_p12 }
  0x48   : > { %p1329_p6 = pneg %p1328_p2 }
  0x4a   : > { %p1334_p3 = pnand %p1332_p0, %p1329_p6 }
  0x4c   : > { %1337 = shalt.err (!%p1334_p3)
}
  0x4d   : > { %s1338_s12 = scalar_lea.vmem %s1727_s15, 1024  ;;  %p1346_p11 = scmp.lt.s32.totalorder %s1727_s15, %s1727_s15 }
  0x4e   : > { %p1339_p5 = scmp.ne.s32.totalorder %s1727_s15, %s1338_s12  ;;  %p1347_p13 = scmp.lt.s32.totalorder %s1338_s12, %s1338_s12 }
  0x50   : > { %p1341_p7 = pnand %p1339_p5, %p1739_p12  ;;  %p1348_p1 = por %p1347_p13, %p1346_p11 }
  0x52   : > { %p1342_p9 = pneg %p1341_p7 }
  0x54   : > { %p1349_p2 = pnand %p1348_p1, %p1342_p9 }
  0x56   : > { %1352 = shalt.err (!%p1349_p2)
}
  0x57   : > { %1197 = dma.hbm_to_vmem [thread:$0]  (!%p1723_p10), %s2106_s5, 1024, %s1727_s15, [#allocation6], %s1582_s11, %s1582_s11, %s1583_s17  }
  0x58   : > { %s2107_s7 = sld [smem:[#allocation26_spill]] }
  0x5e   : > { %s1353_s28 = scalar_lea.hbm %s2107_s7, 1024 }
  0x5f   : > { %p1354_p6 = scmp.ne.s32.totalorder %s2107_s7, %s1353_s28  ;;  %p1360_p5 = scmp.lt.u32.totalorder %s1353_s28, %s2107_s7 }
  0x61   : > { %p1356_p0 = pnand %p1354_p6, %p1739_p12 }
  0x63   : > { %p1357_p3 = pneg %p1356_p0 }
  0x65   : > { %p1362_p7 = pnand %p1360_p5, %p1357_p3 }
  0x67   : > { %1365 = shalt.err (!%p1362_p7)
}
  0x68   : > { %s1366_s12 = scalar_lea.vmem %s381_s26, 1024  ;;  %p1374_p1 = scmp.lt.s32.totalorder %s381_s26, %s381_s26 }
  0x69   : > { %p1367_p9 = scmp.ne.s32.totalorder %s381_s26, %s1366_s12  ;;  %p1375_p2 = scmp.lt.s32.totalorder %s1366_s12, %s1366_s12 }
  0x6b   : > { %p1369_p11 = pnand %p1367_p9, %p1739_p12  ;;  %p1376_p4 = por %p1375_p2, %p1374_p1 }
  0x6d   : > { %p1370_p13 = pneg %p1369_p11 }
  0x6f   : > { %p1377_p8 = pnand %p1376_p4, %p1370_p13 }
  0x71   : > { %1380 = shalt.err (!%p1377_p8)
}
  0x72   : > { %1200 = dma.hbm_to_vmem [thread:$0]  (!%p1723_p10), %s2107_s7, 1024, %s381_s26, [#allocation9], %s1582_s11, %s1582_s11, %s1583_s17  }
  0x73   : > { %s42_s9 = sadd.s32 1, %s1569_s22  ;;  %s45_s13 = sadd.s32 1, %s1573_s23 }
  0x74   : > { %p43_p4 = scmp.ge.s32.totalorder %s42_s9, 2  ;;  %s54_s6 = sadd.s32 1, %s1557_s19 }
  0x75   : > { %p61_p8 = scmp.ne.s32.totalorder %s1557_s19, %s1553_s18  ;;  %p62_p12 = scmp.eq.s32.totalorder %s1577_s24, 0 }
  0x76   : > { %s2137_s9 = smov (%p43_p4, %s42_s9), 0  ;;  %s2139_s13 = smov (!%p43_p4, %s45_s13), %s1573_s23 }
  0x77   : > { %s50_s10 = ssub.s32 %s1569_s22, %s2137_s9  ;;  %p47_p6 = scmp.ge.s32.totalorder %s2139_s13, 2 }
  0x78   : > { %p2108_p0 = scmp.eq.s32.totalorder %s1692_s25, 3  ;;  %p1828_p10 = por %p62_p12, %p61_p8 }
  0x79   : > { %p1218_p5 = scmp.lt.s32.totalorder %s1577_s24, 4  ;;  %s2141_s13 = smov (%p47_p6, %s2139_s13), 0 }
  0x7a   : > { %p1824_p3 = por %p2108_p0, %p61_p8  ;;  %s397_s11 = sand.u32 1, %s1557_s19  }
  0x7b   : > { %s1022_s17 = sshll.u32 %s1573_s23, 1  ;;  %s49_s28 = ssub.s32 %s1573_s23, %s2141_s13 }
  0x7c   : > { %s51_s30 = sor.u32 %s50_s10, %s49_s28  ;;  %s1021_s14 = sshll.u32 %s397_s11, 3 }
  0x7d   : > { %p52_p7 = scmp.eq.s32.totalorder %s51_s30, 0  ;;  %s406_s16 = sadd.s32 %s1569_s22, %s1022_s17 }
  0x7e   : > { %s401_s8 = scalar_lea.vmem [#allocation2], %s1021_s14  ;;  %s1023_s4 = sshll.u32 %s406_s16, 7 }
  0x7f   : > { %s410_s12 = sshll.u32 %s401_s8, 4  ;;  %s1848_s7 = scalar_lea.hbm %s2067_s0, %s1023_s4  ;;  %s1843_s12 = int_to_ptr.vmem [resolvable:$true] %s410_s12 }
  0x80   : > { %s1841_s15 = scalar_select %p52_p7, %s1557_s19, %s54_s6  }
  0x81   : > { %p1854_p9 = pnand %p1218_p5, %p1828_p10  ;;  %s398_s6 = scalar_lea.sflag [#allocation3], %s397_s11 }
  0x82   : > { %s1381_s17 = scalar_lea.hbm %s1848_s7, 128  ;;  %s1386_s26 = scalar_lea.hbm %s2067_s0, 512 }
  0x83   : > { %p1382_p11 = scmp.ne.s32.totalorder %s1848_s7, %s1381_s17  ;;  %p1383_p13 = pneg %p1854_p9 }
  0x84   : > { %p1387_p4 = scmp.lt.u32.totalorder %s1848_s7, %s2067_s0  ;;  %p1388_p8 = scmp.lt.u32.totalorder %s1386_s26, %s1381_s17 }
  0x85   : > { %p1384_p1 = pnand %p1383_p13, %p1382_p11  ;;  %p1390_p6 = scmp.lt.u32.totalorder %s1381_s17, %s1848_s7 }
  0x86   : > { %p1389_p12 = por %p1388_p8, %p1387_p4 }
  0x87   : > { %p1385_p2 = pneg %p1384_p1 }
  0x88   : > { %p1391_p0 = por %p1390_p6, %p1389_p12 }
  0x8a   : > { %p1392_p10 = pnand %p1391_p0, %p1385_p2 }
  0x8c   : > { %1395 = shalt.err (!%p1392_p10)
}
  0x8d   : > { %s1396_s11 = scalar_lea.vmem %s1843_s12, 128  ;;  %s1584_s14 = smov [#allocation2]  }
  0x8e   : > { %p1397_p5 = scmp.ne.s32.totalorder %s1843_s12, %s1396_s11  ;;  %s1401_s16 = sshll.u32 %s1584_s14, 4  ;;  %s1402_s16 = int_to_ptr.vmem [resolvable:$false] %s1401_s16 }
  0x8f   : > { %s1403_s8 = scalar_lea.vmem %s1402_s16, 256  ;;  %p1404_p1 = scmp.lt.s32.totalorder %s1843_s12, %s1402_s16 }
  0x90   : > { %p1399_p7 = pnand %p1397_p5, %p1383_p13  ;;  %p1405_p4 = scmp.lt.s32.totalorder %s1403_s8, %s1396_s11 }
  0x92   : > { %p1400_p11 = pneg %p1399_p7  ;;  %p1406_p8 = por %p1405_p4, %p1404_p1 }
  0x94   : > { %p1407_p12 = pnand %p1406_p8, %p1400_p11 }
  0x96   : > { %1410 = shalt.err (!%p1407_p12)
}
  0x97   : > { %1204 = dma.hbm_to_vmem [thread:$0]  (!%p1854_p9), %s1848_s7, 128, %s1843_s12, %s398_s6  }
  0x98   : > { %p2112_p2 = scmp.ne.s32.totalorder %s2102_s29, 0 }
  0x99   : > { %s1886_s4 = sand.u32 (!%p2112_p2), 1, %s1553_s18   ;;  %p2113_p13 = scmp.ne.s32.totalorder (!%p2112_p2), %s2099_s27, 0 }
  0x9a   : > { %419 = sbr.rel (%p2112_p2) target bundleno = 759 (0x2f7), region = 56  ;;  %s1889_s17 = sshll.u32 (!%p2112_p2), %s1886_s4, 3 }
  0x9b   : > { %s422_s3 = scalar_lea.sflag (!%p2112_p2), [#allocation3], %s1886_s4  ;;  %s425_s5 = scalar_lea.vmem (!%p2112_p2), [#allocation2], %s1889_s17 }
  0xa1   : > { %1528 = dma.done.wait (%p2113_p13), %s422_s3, 128  }
  0xa2   : > { %1530 = vsyncadd (%p2113_p13), %s422_s3, 4294967168  ;;  %p2114_p9 = scmp.eq.s32.totalorder %s1692_s25, 0 }
  0xa4   : > { %1532 = dma.done.wait (%p2114_p9), [#allocation6], 2048   ;;  %p2115_p6 = pmov %p2114_p9 }
  0xa6   : > { %1534 = vsyncadd (%p2115_p6), [#allocation6], 4294965248  ;;  %p2116_p0 = pmov %p2115_p6 }
  0xa8   : > { %1536 = dma.done.wait (%p2116_p0), [#allocation9], 1024   ;;  %p2117_p10 = pmov %p2116_p0 }
  0xa9   : > { %vm489_vm0 = vcmask 523264   ;;  %v486_v0 = vld [vmem:[%s425_s5] sm:$0xff]  ;;  %v518_v7 = vld [vmem:[#allocation5] sm:$0xff]  ;;  %v519_v8 = vld [vmem:[#allocation5 + $0x8] sm:$0xff]  ;;  %v1585_v12 = vmov 0.0|0.0   ;;  %vm1586_vm1 = vmmov 0  }
  0xaa   : > { %1538 = vsyncadd (%p2117_p10), [#allocation9], 4294966272  ;;  %v490_v1 = vsel %vm489_vm0, %v486_v0, 0.0  ;;  %v1136_v9 = vpack.c.bf16 %v519_v8, %v518_v7  ;;  %v607_v10 = vld [vmem:[#allocation7] sm:$0xff]  ;;  %v608_v11 = vld [vmem:[#allocation7 + $0x8] sm:$0xff]  ;;  %1135 = vmatprep.subr.bf16.mxu0 %v1585_v12  ;;  %1147 = vmatprep.subr.bf16.mxu1 %v1585_v12  ;;  %v1587_v19 = vmov 0.0  }
  0xab   : > { %491 = vadd.xlane.f32.xlu0 %v490_v1  ;;  %v1148_v13 = vpack.c.bf16 %v608_v11, %v607_v10  ;;  %v520_v14 = vld [vmem:[#allocation5 + $0x10] sm:$0xff]  ;;  %v521_v15 = vld [vmem:[#allocation5 + $0x18] sm:$0xff]  ;;  %1094 = vmatprep.mubr.msk.f32.mxu0 %vm1586_vm1, %v1587_v19  ;;  %v522_v21 = vld [vmem:[#allocation5 + $0x20] sm:$0xff]  ;;  %s2118_s10 = sld [smem:[#allocation20_spill]]  ;;  %s1043_s6 = sshll.u32 %s1565_s21, 1 }
  0xac   : > { %v609_v16 = vld [vmem:[#allocation7 + $0x10] sm:$0xff]  ;;  %1137 = vmatpush3.bf16.msra.mxu0 %v1136_v9  ;;  %v1139_v17 = vpack.c.bf16 %v521_v15, %v520_v14  ;;  %v610_v18 = vld [vmem:[#allocation7 + $0x18] sm:$0xff]  ;;  %v523_v22 = vld [vmem:[#allocation5 + $0x28] sm:$0xff]  ;;  %1113 = vmatprep.mubr.msk.f32.mxu1 %vm1586_vm1, %v1587_v19  ;;  %s784_s28 = sand.u32 1, %s1692_s25   ;;  %s2119_s16 = sld [smem:[#allocation23_spill]] }
  0xad   : > { %1149 = vmatpush3.bf16.msra.mxu1 %v1148_v13  ;;  %1138 = vmatprep.subr.bf16.mxu0 %v1585_v12  ;;  %v1151_v20 = vpack.c.bf16 %v610_v18, %v609_v16  ;;  %v611_v23 = vld [vmem:[#allocation7 + $0x20] sm:$0xff]  ;;  %v612_v24 = vld [vmem:[#allocation7 + $0x28] sm:$0xff]  ;;  %v1142_v25 = vpack.c.bf16 %v523_v22, %v522_v21  ;;  %v524_v27 = vld [vmem:[#allocation5 + $0x30] sm:$0xff]  ;;  %s2120_s5 = sld [smem:[#allocation25_spill]]  ;;  %s478_s7 = scalar_lea.vmem [#allocation11], %s1889_s17 }
  0xae   : > { %1150 = vmatprep.subr.bf16.mxu1 %v1585_v12  ;;  %v1154_v26 = vpack.c.bf16 %v612_v24, %v611_v23  ;;  %v525_v28 = vld [vmem:[#allocation5 + $0x38] sm:$0xff]  ;;  %v613_v29 = vld [vmem:[#allocation7 + $0x30] sm:$0xff]  ;;  %v693_v39 = vld [vmem:[#allocation8] sm:$0xff]  ;;  %s820_s27 = sshll.u32 %s478_s7, 4  ;;  %s471_s29 = scalar_lea.vmem [#allocation10], %s1889_s17  ;;  %s1950_s27 = int_to_ptr.vmem [resolvable:$true] %s820_s27 }
  0xaf   : > { %v614_v30 = vld [vmem:[#allocation7 + $0x38] sm:$0xff]  ;;  %v1145_v31 = vpack.c.bf16 %v525_v28, %v524_v27  ;;  %v1032_v37 = vld [vmem:[%s2068_s1] ss:$0 sm:$0xff]  ;;  %v694_v40 = vld [vmem:[#allocation8 + $0x8] sm:$0xff]  ;;  %s805_s12 = sshll.u32 %s471_s29, 4  ;;  %s2122_s14 = sld [smem:[#allocation28_spill]]  ;;  %s1958_s12 = int_to_ptr.vmem [resolvable:$true] %s805_s12 }
  0xb0   : > { %1140 = vmatpush3.bf16.msra.mxu0 %v1139_v17  ;;  %v1157_v32 = vpack.c.bf16 %v614_v30, %v613_v29  ;;  %v1033_v41 = vld [vmem:[%s2069_s2] ss:$0 sm:$0xff]  ;;  %v1160_v43 = vpack.c.bf16 %v694_v40, %v693_v39  ;;  %v696_v46 = vld [vmem:[#allocation8 + $0x18] sm:$0xff]  ;;  %v697_v48 = vld [vmem:[#allocation8 + $0x20] sm:$0xff]  ;;  %s1962_s8 = scalar_lea.sflag [#allocation12], %s784_s28  ;;  %s1411_s3 = scalar_lea.vmem %s1950_s27, 128 }
  0xb1   : > { %1152 = vmatpush3.bf16.msra.mxu1 %v1151_v20  ;;  %1141 = vmatprep.subr.bf16.mxu0 %v1585_v12  ;;  %v695_v45 = vld [vmem:[#allocation8 + $0x10] sm:$0xff]  ;;  %v698_v49 = vld [vmem:[#allocation8 + $0x28] sm:$0xff]  ;;  %v700_v52 = vld [vmem:[#allocation8 + $0x38] sm:$0xff]  ;;  %s801_s26 = sadd.s32 %s2118_s10, %s1043_s6  ;;  %s2121_s10 = sld [smem:[#allocation29_spill]] }
  0xb2   : > { %1153 = vmatprep.subr.bf16.mxu1 %v1585_v12  ;;  %v1163_v47 = vpack.c.bf16 %v696_v46, %v695_v45  ;;  %v1166_v50 = vpack.c.bf16 %v698_v49, %v697_v48  ;;  %v699_v51 = vld [vmem:[#allocation8 + $0x30] sm:$0xff]  ;;  %s1934_s30 = sshll.u32 %s801_s26, 7  ;;  %p1412_p5 = scmp.ne.s32.totalorder %s1950_s27, %s1411_s3 }
  0xb3   : > { %v1169_v53 = vpack.c.bf16 %v700_v52, %v699_v51  ;;  %v1034_v54 = vld [vmem:[%s2119_s16] ss:$0 sm:$0xff] }
  0xb4   : > { %1143 = vmatpush3.bf16.msra.mxu0 %v1142_v25  ;;  %v1036_v55 = vld [vmem:[%s2120_s5] ss:$0 sm:$0xff]  ;;  %p1413_p7 = pnand %p1412_p5, %p1824_p3  ;;  %s1588_s5 = smov [#allocation11]  }
  0xb5   : > { %1155 = vmatpush3.bf16.msra.mxu1 %v1154_v26  ;;  %1144 = vmatprep.subr.bf16.mxu0 %v1585_v12  ;;  %s1956_s16 = scalar_lea.hbm %s2122_s14, %s1934_s30  ;;  %s1415_s21 = sshll.u32 %s1588_s5, 4  ;;  %s1416_s21 = int_to_ptr.vmem [resolvable:$false] %s1415_s21 }
  0xb6   : > { %1156 = vmatprep.subr.bf16.mxu1 %v1585_v12  ;;  %p1414_p11 = pneg %p1413_p7  ;;  %s1417_s25 = scalar_lea.vmem %s1416_s21, 256 }
  0xb7   : > { %s1948_s6 = scalar_lea.hbm %s2121_s10, %s1934_s30  ;;  %p1418_p1 = scmp.lt.s32.totalorder %s1950_s27, %s1416_s21 }
  0xb8   : > { %1146 = vmatpush3.bf16.msra.mxu0 %v1145_v31  ;;  %p1419_p4 = scmp.lt.s32.totalorder %s1417_s25, %s1411_s3 }
  0xb9   : > { %1158 = vmatpush3.bf16.msra.mxu1 %v1157_v32  ;;  %1159 = vmatprep.subr.bf16.mxu0 %v1585_v12 }
  0xba   : > { %p1420_p8 = por %p1419_p4, %p1418_p1 }
  0xbc   : > { %p1421_p12 = pnand %p1420_p8, %p1414_p11 }
 0x138   : > { %v492_v2 = vpop.xlane.xlu0 %491 }
 0x139   : > { %v494_v3 = vmul.f32 0.015625, %v492_v2 }
 0x13b   : > { %v495_v4 = vsub.f32 %v486_v0, %v494_v3 }
 0x13d   : > { %v496_v5 = vmul.f32 %v495_v4, %v495_v4 }
 0x13f   : > { %v497_v6 = vsel %vm489_vm0, %v496_v5, 0.0 }
 0x140   : > { %498 = vadd.xlane.f32.xlu0 %v497_v6 }
 0x1cd   : > { %v499_v33 = vpop.xlane.xlu0 %498 }
 0x1ce   : > { %v500_v34 = vmul.f32 0.015625, %v499_v33 }
 0x1d0   : > { %v501_v35 = vadd.f32 1e-05, %v500_v34 }
 0x1d2   : > { %1295 = vrsqrt.f32 %v501_v35 }
 0x1dc   : > { %v1296_v36 = vpop.eup %1295 }
 0x1dd   : > { %v503_v38 = vmul.f32 %v1296_v36, %v495_v4 }
 0x1df   : > { %v510_v42 = vmul.f32 %v1032_v37, %v503_v38 }
 0x1e1   : > { %v517_v44 = vadd.f32 %v1033_v41, %v510_v42 }
 0x1e3   : > { %1095 = vmatmul.mubr.msk.f32.vlgmr.msra.gmra.mrb[0].mxu0 %vm489_vm0, %v517_v44  ;;  %1114 = vmatmul.mubr.msk.f32.vlgmr.msra.gmra.mrb[0].mxu1 %vm489_vm0, %v517_v44 }
 0x1e4   : > { %1161 = vmatpush3.bf16.msra.mxu0 %v1160_v43  ;;  %1132 = vmatprep.mubr.msk.f32.mxu0 %vm1586_vm1, %v1587_v19 }
 0x1e5   : > { %1162 = vmatprep.subr.bf16.mxu0 %v1585_v12 }
 0x1e8   : > { %1164 = vmatpush3.bf16.msra.mxu0 %v1163_v47 }
 0x1e9   : > { %1165 = vmatprep.subr.bf16.mxu0 %v1585_v12 }
 0x1ec   : > { %1167 = vmatpush3.bf16.msra.mxu0 %v1166_v50 }
 0x1ed   : > { %1168 = vmatprep.subr.bf16.mxu0 %v1585_v12 }
 0x1f0   : > { %1170 = vmatpush3.bf16.msra.mxu0 %v1169_v53 }
 0x1f3   : > { %1133 = vmatmul.mubr.msk.f32.vlgmr.msra.gmra.mrb[2].mxu0 %vm489_vm0, %v517_v44 }
 0x2b6   : > { %v602_v56 = vpop.f32.mrb[0].mxu0  ;;  %v688_v57 = vpop.f32.mrb[0].mxu1 }
 0x2b7   : > { %v603_v58 = vadd.f32 %v1034_v54, %v602_v56  ;;  %v689_v59 = vadd.f32 %v1036_v55, %v688_v57  ;;  %v1096_v60 = vpop.f32.mrb[1].mxu0  ;;  %v1115_v61 = vpop.f32.mrb[1].mxu1 }
 0x2b9   : > { %692 = vst.msk [vmem:[%s478_s7] sm:$0xff] %vm489_vm0, %v689_v59  ;;  %606 = vst.msk [vmem:[%s471_s29] sm:$0xff] %vm489_vm0, %v603_v58 }
 0x2ba   : > { %1424 = shalt.err (!%p1421_p12)
}
 0x2bb   : > { %s1425_s28 = scalar_lea.hbm %s1948_s6, 128  ;;  %s1429_s26 = scalar_lea.hbm %s2121_s10, 512 }
 0x2bc   : > { %p1426_p2 = scmp.ne.s32.totalorder %s1948_s6, %s1425_s28  ;;  %p1430_p6 = scmp.lt.u32.totalorder %s1948_s6, %s2121_s10 }
 0x2bd   : > { %p1431_p0 = scmp.lt.u32.totalorder %s1429_s26, %s1425_s28  ;;  %p1433_p5 = scmp.lt.u32.totalorder %s1425_s28, %s1948_s6 }
 0x2be   : > { %p1427_p13 = pnand %p1426_p2, %p1824_p3 }
 0x2bf   : > { %p1432_p10 = por %p1431_p0, %p1430_p6 }
 0x2c0   : > { %p1428_p9 = pneg %p1427_p13 }
 0x2c1   : > { %p1434_p7 = por %p1433_p5, %p1432_p10 }
 0x2c3   : > { %p1435_p11 = pnand %p1434_p7, %p1428_p9 }
 0x2c5   : > { %1438 = shalt.err (!%p1435_p11)
}
 0x2c6   : > { %1186 = dma.vmem_to_hbm [thread:$0]  (%p1824_p3), %s1950_s27, 128, %s1948_s6, %s1962_s8  }
 0x2c7   : > { %s780_s3 = scalar_lea.sflag [#allocation4], %s1886_s4  ;;  %s1439_s21 = scalar_lea.vmem %s1958_s12, 128 }
 0x2c8   : > { %p1440_p1 = scmp.ne.s32.totalorder %s1958_s12, %s1439_s21  ;;  %s1589_s25 = smov [#allocation10]  }
 0x2c9   : > { %s1443_s28 = sshll.u32 %s1589_s25, 4  ;;  %s1444_s28 = int_to_ptr.vmem [resolvable:$false] %s1443_s28 }
 0x2ca   : > { %p1441_p4 = pnand %p1440_p1, %p1824_p3  ;;  %s1445_s7 = scalar_lea.vmem %s1444_s28, 256 }
 0x2cb   : > { %p1446_p12 = scmp.lt.s32.totalorder %s1958_s12, %s1444_s28  ;;  %p1447_p2 = scmp.lt.s32.totalorder %s1445_s7, %s1439_s21 }
 0x2cc   : > { %p1442_p8 = pneg %p1441_p4 }
 0x2cd   : > { %p1448_p13 = por %p1447_p2, %p1446_p12 }
 0x2cf   : > { %p1449_p9 = pnand %p1448_p13, %p1442_p8 }
 0x2d1   : > { %1452 = shalt.err (!%p1449_p9)
}
 0x2d2   : > { %s1453_s4 = scalar_lea.hbm %s1956_s16, 128  ;;  %s1457_s29 = scalar_lea.hbm %s2122_s14, 512 }
 0x2d3   : > { %p1454_p6 = scmp.ne.s32.totalorder %s1956_s16, %s1453_s4  ;;  %p1458_p5 = scmp.lt.u32.totalorder %s1956_s16, %s2122_s14 }
 0x2d4   : > { %p1459_p7 = scmp.lt.u32.totalorder %s1457_s29, %s1453_s4  ;;  %p1461_p1 = scmp.lt.u32.totalorder %s1453_s4, %s1956_s16 }
 0x2d5   : > { %p1455_p0 = pnand %p1454_p6, %p1824_p3 }
 0x2d6   : > { %p1460_p11 = por %p1459_p7, %p1458_p5 }
 0x2d7   : > { %p1456_p10 = pneg %p1455_p0 }
 0x2d8   : > { %p1462_p4 = por %p1461_p1, %p1460_p11 }
 0x2da   : > { %p1463_p8 = pnand %p1462_p4, %p1456_p10 }
 0x2dc   : > { %1466 = shalt.err (!%p1463_p8)
}
 0x2dd   : > { %1185 = dma.vmem_to_hbm [thread:$0]  (%p1824_p3), %s1958_s12, 128, %s1956_s16, %s780_s3   ;;  %v774_v63 = vpop.f32.mrb[2].mxu0 }
 0x2de   : > { %s2123_s25 = sld [smem:[#allocation27_spill]]  ;;  %s485_s28 = scalar_lea.vmem [#allocation13], %s1889_s17  ;;  %v1134_v1 = vpop.f32.mrb[3].mxu0 }
 0x2df   : > { %s835_s7 = sshll.u32 %s485_s28, 4  ;;  %s2124_s6 = sld [smem:[#allocation30_spill]]  ;;  %s836_s7 = int_to_ptr.vmem [resolvable:$true] %s835_s7 }
 0x2e0   : > { %s1467_s26 = scalar_lea.vmem %s836_s7, 128  ;;  %s1590_s12 = smov [#allocation13]  }
 0x2e1   : > { %p1468_p12 = scmp.ne.s32.totalorder %s836_s7, %s1467_s26  ;;  %s1471_s16 = sshll.u32 %s1590_s12, 4  ;;  %s1472_s16 = int_to_ptr.vmem [resolvable:$false] %s1471_s16 }
 0x2e2   : > { %s1473_s17 = scalar_lea.vmem %s1472_s16, 256  ;;  %p1474_p9 = scmp.lt.s32.totalorder %s836_s7, %s1472_s16 }
 0x2e3   : > { %p1469_p2 = pnand %p1468_p12, %p1824_p3  ;;  %p1475_p6 = scmp.lt.s32.totalorder %s1473_s17, %s1467_s26 }
 0x2e4   : > { %v1038_v62 = vld [vmem:[%s2123_s25] ss:$0 sm:$0xff] }
 0x2e5   : > { %v775_v0 = vadd.f32 %v1038_v62, %v774_v63  ;;  %s2016_s29 = scalar_lea.hbm %s2124_s6, %s1934_s30  ;;  %p1470_p13 = pneg %p1469_p2 }
 0x2e6   : > { %p1476_p0 = por %p1475_p6, %p1474_p9 }
 0x2e7   : > { %778 = vst.msk [vmem:[%s485_s28] sm:$0xff] %vm489_vm0, %v775_v0 }
 0x2e8   : > { %p1477_p10 = pnand %p1476_p0, %p1470_p13 }
 0x2ea   : > { %1480 = shalt.err (!%p1477_p10)
}
 0x2eb   : > { %s1481_s30 = scalar_lea.hbm %s2016_s29, 128  ;;  %s1485_s5 = scalar_lea.hbm %s2124_s6, 512 }
 0x2ec   : > { %p1482_p5 = scmp.ne.s32.totalorder %s2016_s29, %s1481_s30  ;;  %p1486_p1 = scmp.lt.u32.totalorder %s2016_s29, %s2124_s6 }
 0x2ed   : > { %p1487_p4 = scmp.lt.u32.totalorder %s1485_s5, %s1481_s30  ;;  %p1489_p12 = scmp.lt.u32.totalorder %s1481_s30, %s2016_s29 }
 0x2ee   : > { %p1483_p7 = pnand %p1482_p5, %p1824_p3 }
 0x2ef   : > { %p1488_p8 = por %p1487_p4, %p1486_p1 }
 0x2f0   : > { %p1484_p11 = pneg %p1483_p7 }
 0x2f1   : > { %p1490_p2 = por %p1489_p12, %p1488_p8 }
 0x2f3   : > { %p1491_p13 = pnand %p1490_p2, %p1484_p11 }
 0x2f5   : > { %1494 = shalt.err (!%p1491_p13)
}
 0x2f6   : > { %1187 = dma.vmem_to_hbm [thread:$0]  (%p1824_p3), %s836_s7, 128, %s2016_s29, %s1962_s8  }
 0x2f7 PF: > { %s2125_s28 = sld [smem:[#allocation19_spill]]  ;;  %s2126_s4 = sld [smem:[#allocation21_spill]] }
 0x2f8   : > { %p1222_p9 = scmp.ge.s32.totalorder %s1577_s24, 2 }
 0x2fd   : > { %s847_s27 = sand.u32 1, %s2125_s28   ;;  %p2127_p6 = scmp.ne.s32.totalorder %s2126_s4, 0 }
 0x2fe   : > { %s848_s26 = scalar_lea.sflag [#allocation4], %s847_s27 }
 0x2ff   : > { %p1206_p0 = pnand %p1222_p9, %p2127_p6 }
 0x301   : > { %1540 = dma.done.wait (!%p1206_p0), %s848_s26, 128  }
 0x302   : > { %1542 = vsyncadd (!%p1206_p0), %s848_s26, 4294967168  ;;  %s2128_s12 = sadd.s32 4294967294, %s1577_s24  }
 0x303   : > { %s856_s16 = sand.u32 1, %s2128_s12  }
 0x304   : > { %s857_s17 = scalar_lea.sflag [#allocation12], %s856_s16 }
 0x305   : > { %1544 = dma.done.wait (!%p1206_p0), %s857_s17, 256  }
 0x306   : > { %1546 = vsyncadd (!%p1206_p0), %s857_s17, 4294967040  ;;  %s33_s24 = sadd.s32 1, %s1577_s24   ;;  %s2129_s17 = smov %s1553_s18 }
 0x307   : > { %p30_p3 = scmp.ge.s32.totalorder %s33_s24, 6   ;;  %s2130_s18 = smov %s1557_s19 }
 0x308   : > { %s2131_s19 = smov %s1841_s15  ;;  %s2132_s20 = smov %s1569_s22 }
 0x309   : > { %s2133_s21 = smov %s1573_s23  ;;  %s2134_s22 = smov %s2137_s9 }
 0x30a   : > { %s2135_s23 = smov %s2141_s13  ;;  %32 = sbr.rel (!%p30_p3) target bundleno = 21 (0x15), region = 145 }
 0x311   :  { %871 = vsyncpa [#allocation3], 1 }
 0x312   :  { %873 = vsyncpa [#allocation3 + $0x1], 1 }
 0x313   :  { %874 = vsyncpa [#allocation6], 1 }
 0x314   :  { %875 = vsyncpa [#allocation9], 1 }
 0x315   :  { %876 = vsyncpa [#allocation4], 1 }
 0x316   :  { %878 = vsyncpa [#allocation4 + $0x1], 1 }
 0x317   :  { %879 = vsyncpa [#allocation12], 1 }
 0x318   :  { %881 = vsyncpa [#allocation12 + $0x1], 1 }

</bundles_post_ra>
